<compile_context>
chip_gen: v7x
topology: tpu7x:2x2x1
jax: 0.10.0
libtpu: 0.0.40
codegen_flags: <defaults>
</compile_context>

<pallas_src>
import jax
import jax.numpy as jnp
from jax.experimental import pallas as pl
from jax.experimental.pallas import tpu as pltpu


# ---------------------------------------------------------------------------
# Tiled linear kernels:  y = x @ w_oi^T (+ b)   (w_oi kept in torch (out, in) layout)
# ---------------------------------------------------------------------------
def _linear_kernel(x_ref, w_ref, o_ref, acc_ref):
    @pl.when(pl.program_id(2) == 0)
    def _():
        acc_ref[...] = jnp.zeros_like(acc_ref)

    acc_ref[...] += jax.lax.dot_general(
        x_ref[...], w_ref[...], (((1,), (1,)), ((), ())),
        preferred_element_type=jnp.float32)

    @pl.when(pl.program_id(2) == pl.num_programs(2) - 1)
    def _():
        o_ref[...] = acc_ref[...].astype(o_ref.dtype)


def _linear_bias_kernel(x_ref, w_ref, b_ref, o_ref, acc_ref):
    @pl.when(pl.program_id(2) == 0)
    def _():
        acc_ref[...] = jnp.zeros_like(acc_ref)

    acc_ref[...] += jax.lax.dot_general(
        x_ref[...], w_ref[...], (((1,), (1,)), ((), ())),
        preferred_element_type=jnp.float32)

    @pl.when(pl.program_id(2) == pl.num_programs(2) - 1)
    def _():
        o_ref[...] = (acc_ref[...] + b_ref[...].astype(jnp.float32)
                      ).astype(o_ref.dtype)


def _round_up(x, m):
    return ((x + m - 1) // m) * m


def _choose_tile(dim, pref, align):
    """Full dim when it is small, otherwise a fixed aligned tile (the array is padded
    up to a tile multiple by the caller).  Keeps the VMEM footprint bounded instead of
    falling back to an arbitrarily large full-dimension block."""
    if dim <= pref:
        return dim
    return (pref // align) * align


def pallas_linear(x2d, w_oi, b=None):
    """x2d: (M, K); w_oi: (Nout, K) torch (out, in) layout; b: (Nout,) or None."""
    M, K = x2d.shape
    Nout, K2 = w_oi.shape
    assert K2 == K
    dtype = x2d.dtype
    w_oi = w_oi.astype(dtype)

    # Tile prefs per the perf review (512-wide tiles; tk multiple of 128).
    # Double-buffered footprint at 512^3 is ~7 MB -> fits every generation's scoped
    # VMEM default (v5e 16 MiB, v6e/v7x 32 MiB), so no vmem_limit override is needed.
    tm = _choose_tile(M, 512, 8)       # use align=16 if feeding bf16 operands
    tn = _choose_tile(Nout, 512, 128)
    tk = _choose_tile(K, 512, 128)

    Mp, Np, Kp = _round_up(M, tm), _round_up(Nout, tn), _round_up(K, tk)
    if (Mp, Kp) != (M, K):
        x2d = jnp.pad(x2d, ((0, Mp - M), (0, Kp - K)))
    if (Np, Kp) != (Nout, K):
        w_oi = jnp.pad(w_oi, ((0, Np - Nout), (0, Kp - K)))

    args = [x2d, w_oi]
    in_specs = [
        pl.BlockSpec((tm, tk), lambda i, j, k: (i, k)),
        pl.BlockSpec((tn, tk), lambda i, j, k: (j, k)),
    ]
    if b is not None:
        b2d = b.reshape(1, Nout).astype(dtype)
        if Np != Nout:
            b2d = jnp.pad(b2d, ((0, 0), (0, Np - Nout)))
        args.append(b2d)
        in_specs.append(pl.BlockSpec((1, tn), lambda i, j, k: (0, j)))
        kernel = _linear_bias_kernel
    else:
        kernel = _linear_kernel       # no zero-bias materialization / DMA

    out = pl.pallas_call(
        kernel,
        out_shape=jax.ShapeDtypeStruct((Mp, Np), dtype),
        grid_spec=pltpu.PrefetchScalarGridSpec(
            num_scalar_prefetch=0,
            grid=(Mp // tm, Np // tn, Kp // tk),
            in_specs=in_specs,
            out_specs=pl.BlockSpec((tm, tn), lambda i, j, k: (i, j)),
            scratch_shapes=[pltpu.VMEM((tm, tn), jnp.float32)],
        ),
        compiler_params=pltpu.CompilerParams(
            dimension_semantics=("parallel", "parallel", "arbitrary")),
    )(*args)

    if (Mp, Np) != (M, Nout):
        out = out[:M, :Nout]
    return out


# ---------------------------------------------------------------------------
# Fused bottleneck split attention: one grid step per batch, all heads at once.
# Input: the raw qkv activation (B, N, 3D); output already in (B, N, D) token order.
# ---------------------------------------------------------------------------
def _make_attn_kernel(scale, C, t, H, d):
    N = C * t
    D = H * d
    inv_t = float(1.0 / t)
    f32 = jnp.float32

    def kernel(qkv_ref, o_ref):
        x = qkv_ref[...].astype(f32)                                  # (N, 3D)

        # Channel (temporal-mean) pooling of q/k/v for every head with ONE MXU matmul:
        # avg[c, n] = 1/t  iff  token n belongs to channel c  (n in [c*t, (c+1)*t)).
        n_idx = jax.lax.broadcasted_iota(jnp.int32, (C, N), 1)
        c_idx = jax.lax.broadcasted_iota(jnp.int32, (C, N), 0)
        lo = c_idx * t
        avg = (jnp.logical_and(n_idx >= lo, n_idx < lo + t)
               ).astype(f32) * inv_t                                  # (C, N)
        means = jnp.dot(avg, x, preferred_element_type=f32)           # (C, 3D) = [q|k|v]

        # Per-head channel attention (H is small; unrolled 2-D MXU matmuls).
        cols = []
        for h in range(H):
            q_h = means[:, h * d:(h + 1) * d]                         # (C, d)
            k_h = means[:, D + h * d:D + (h + 1) * d]
            v_h = means[:, 2 * D + h * d:2 * D + (h + 1) * d]
            s = jax.lax.dot_general(q_h, k_h, (((1,), (1,)), ((), ())),
                                    preferred_element_type=f32) * scale   # (C, C)
            s = s - jnp.max(s, axis=-1, keepdims=True)
            p = jnp.exp(s)
            ch = jnp.dot(p, v_h, preferred_element_type=f32)          # (C, d)
            # Deferred softmax normalization: scale the (C, d) result instead of
            # dividing the (C, C) weights; reciprocal goes to the EUP slot.
            ch = ch * pl.reciprocal(jnp.sum(p, axis=-1, keepdims=True),
                                    approx=True)
            cols.append(ch)
        ch_all = jnp.concatenate(cols, axis=-1)                       # (C, D)

        # Temporal attention branch: its row-softmax weights sum to 1 and its value
        # matrix has identical rows (the channel result broadcast over t), so the
        # result is exactly ch_all repeated for every temporal position.  Realize the
        # broadcast as an (N, C) @ (C, D) expansion matmul which also lands the output
        # directly in the module's final (c, t) token / (h, d) feature order.
        r_idx = jax.lax.broadcasted_iota(jnp.int32, (N, C), 0)
        e_idx = jax.lax.broadcasted_iota(jnp.int32, (N, C), 1)
        lo2 = e_idx * t
        expand = (jnp.logical_and(r_idx >= lo2, r_idx < lo2 + t)).astype(f32)  # (N, C)
        out = jnp.dot(expand, ch_all, preferred_element_type=f32)     # (N, D)
        o_ref[...] = out.astype(o_ref.dtype)

    return kernel


def _split_attention(qkv, scale, *, C, t, H, d):
    """qkv: (B, N, 3D) straight from the qkv linear -> (B, N, D) attention output."""
    B, N, D3 = qkv.shape
    D = H * d
    assert D3 == 3 * D and N == C * t
    kernel = _make_attn_kernel(scale, C, t, H, d)
    return pl.pallas_call(
        kernel,
        out_shape=jax.ShapeDtypeStruct((B, N, D), qkv.dtype),
        grid_spec=pltpu.PrefetchScalarGridSpec(
            num_scalar_prefetch=0,
            grid=(B,),
            in_specs=[pl.BlockSpec((None, N, 3 * D), lambda b: (b, 0, 0))],
            out_specs=pl.BlockSpec((None, N, D), lambda b: (b, 0, 0)),
        ),
        compiler_params=pltpu.CompilerParams(
            dimension_semantics=("parallel",)),
    )(qkv)


# ---------------------------------------------------------------------------
# Full forward pass
# ---------------------------------------------------------------------------
def bottleneck_split_attention(x, w_qkv, b_qkv, w_proj, b_proj, *,
                               num_heads, nr_channels, qk_scale=None):
    """x: (B, N, D). w_qkv: (3D, D), w_proj: (D, D) in torch (out, in) layout."""
    B, N, D = x.shape
    H = num_heads
    d = D // H
    C = nr_channels
    t = N // C
    assert H * d == D and C * t == N
    scale = float(qk_scale) if qk_scale is not None else float(d) ** (-0.5)

    # 1. qkv projection; output columns are ordered (3, H, d) exactly like the torch
    #    reshape(B, N, 3, H, d) expects -> no activation transpose needed.
    qkv = pallas_linear(x.reshape(B * N, D), w_qkv, b_qkv)            # (B*N, 3D)
    qkv = qkv.reshape(B, N, 3 * D)                                    # free reshape

    # 2+3. fused channel + temporal split attention (output already in (B, N, D)
    #      token order (c, t) / feature order (h, d) -> no transpose before proj).
    attn = _split_attention(qkv, scale, C=C, t=t, H=H, d=d)           # (B, N, D)

    # 4. output projection
    out = pallas_linear(attn.reshape(B * N, D), w_proj, b_proj)       # (B*N, D)
    return out.reshape(B, N, D)


# ---------------------------------------------------------------------------
# Pure-JAX reference (mirrors the PyTorch module, including the full temporal
# attention branch) and self-test.
# ---------------------------------------------------------------------------
def _reference_forward(x, w_qkv, b_qkv, w_proj, b_proj, num_heads, nr_channels,
                       qk_scale=None):
    hp = jax.lax.Precision.HIGHEST
    B, N, D = x.shape
    H = num_heads
    d = D // H
    C = nr_channels
    t = N // C
    scale = qk_scale if qk_scale is not None else d ** (-0.5)

    qkv = jnp.dot(x, w_qkv.T, precision=hp)
    if b_qkv is not None:
        qkv = qkv + b_qkv
    qkv = qkv.reshape(B, N, 3, H, d).transpose(2, 0, 3, 1, 4)
    q, k, v = qkv[0], qkv[1], qkv[2]                                  # (B, H, N, d)
    q = q.reshape(B, H, C, t, d)
    k = k.reshape(B, H, C, t, d)
    v = v.reshape(B, H, C, t, d)

    def attn(q_, k_, v_):
        s = jnp.einsum('...qd,...kd->...qk', q_, k_, precision=hp) * scale
        a = jax.nn.softmax(s, axis=-1)
        return jnp.einsum('...qk,...kd->...qd', a, v_, precision=hp)

    vc = attn(q.mean(-2), k.mean(-2), v.mean(-2))                     # (B, H, C, d)
    qt = jnp.swapaxes(q, 2, 3).mean(-2)                               # (B, H, t, d)
    kt = jnp.swapaxes(k, 2, 3).mean(-2)
    vexp = jnp.broadcast_to(vc.reshape(B, H, 1, C * d), (B, H, t, C * d))
    y = attn(qt, kt, vexp)                                            # (B, H, t, C*d)
    y = y.reshape(B, H, t, C, d).transpose(0, 3, 2, 1, 4).reshape(B, N, D)
    return jnp.dot(y, w_proj.T, precision=hp) + b_proj


if __name__ == "__main__":
    key = jax.random.PRNGKey(0)
    k_x, k_wqkv, k_wproj, k_bproj = jax.random.split(key, 4)

    # Small shapes consistent with the module: dim=32, num_heads=4 (head_dim=8),
    # nr_channels=4, t=4 -> seq N=16, batch B=2. qkv_bias=False (module default).
    B, H, d, C, t = 2, 4, 8, 4, 4
    D, N = H * d, C * t

    x = jax.random.normal(k_x, (B, N, D), dtype=jnp.float32)
    w_qkv = 0.05 * jax.random.normal(k_wqkv, (3 * D, D), dtype=jnp.float32)
    w_proj = 0.05 * jax.random.normal(k_wproj, (D, D), dtype=jnp.float32)
    b_proj = 0.01 * jax.random.normal(k_bproj, (D,), dtype=jnp.float32)

    fwd = jax.jit(lambda xx, wq, wp, bp: bottleneck_split_attention(
        xx, wq, None, wp, bp, num_heads=H, nr_channels=C))
    out = jax.block_until_ready(fwd(x, w_qkv, w_proj, b_proj))

    ref = _reference_forward(x, w_qkv, None, w_proj, b_proj, H, C)
    assert out.shape == (B, N, D)
    max_err = float(jnp.max(jnp.abs(out - ref)))
    assert max_err < 5e-4, f"max abs err {max_err}"
    print("KERNEL_OK")
</pallas_src>

<mosaic_0001>
module attributes {stable_mosaic.version = 11 : i64} {
  func.func @_linear_kernel(%arg0: i32, %arg1: i32, %arg2: i32, %arg3: memref<32x32xf32, #tpu.memory_space<vmem>>, %arg4: memref<96x32xf32, #tpu.memory_space<vmem>>, %arg5: memref<32x96xf32, #tpu.memory_space<vmem>>, %arg6: memref<32x96xf32, #tpu.memory_space<vmem>>) attributes {dimension_semantics = [#tpu.dimension_semantics<parallel>, #tpu.dimension_semantics<parallel>, #tpu.dimension_semantics<arbitrary>], iteration_bounds = array<i64: 1, 1, 1>, scalar_prefetch = 0 : i64, scratch_operands = 1 : i64, tpu.core_type = #tpu.core_type<tc>, window_params = [{transform_indices = @transform_0, window_bounds = array<i64: 32, 32>}, {transform_indices = @transform_1, window_bounds = array<i64: 96, 32>}, {transform_indices = @transform_2, window_bounds = array<i64: 32, 96>}]} {
    %c0_i32 = arith.constant 0 : i32
    %0 = arith.cmpi eq, %arg2, %c0_i32 : i32
    %1 = arith.extui %0 : i1 to i32
    %c0_i32_0 = arith.constant 0 : i32
    %2 = arith.cmpi ne, %1, %c0_i32_0 : i32
    scf.if %2 {
      %cst_10 = arith.constant 0.000000e+00 : f32
      %12 = vector.broadcast %cst_10 : f32 to vector<32x96xf32>
      %c0_11 = arith.constant 0 : index
      %c0_12 = arith.constant 0 : index
      %13 = vector.load %arg6[%c0_11, %c0_12] : memref<32x96xf32, #tpu.memory_space<vmem>>, vector<32x96xf32>
      tpu.vector_store %arg6[%c0_11, %c0_12], %12 {strides = array<i32>} : memref<32x96xf32, #tpu.memory_space<vmem>>, vector<32x96xf32>,
    } else {
    }
    %c0 = arith.constant 0 : index
    %c0_1 = arith.constant 0 : index
    %3 = vector.load %arg6[%c0, %c0_1] : memref<32x96xf32, #tpu.memory_space<vmem>>, vector<32x96xf32>
    %c0_2 = arith.constant 0 : index
    %c0_3 = arith.constant 0 : index
    %4 = vector.load %arg3[%c0_2, %c0_3] : memref<32x32xf32, #tpu.memory_space<vmem>>, vector<32x32xf32>
    %c0_4 = arith.constant 0 : index
    %c0_5 = arith.constant 0 : index
    %5 = vector.load %arg4[%c0_4, %c0_5] : memref<96x32xf32, #tpu.memory_space<vmem>>, vector<96x32xf32>
    %cst = arith.constant dense<0.000000e+00> : vector<32x96xf32>
    %6 = tpu.matmul %4, %5, %cst {dimension_numbers = #tpu.dot_dimension_numbers<[1], [1], [0], [0], [0, 0, 1, 0], [], []>} : vector<32x32xf32>, vector<96x32xf32>, vector<32x96xf32> -> vector<32x96xf32>
    %7 = arith.addf %3, %6 : vector<32x96xf32>
    %c0_6 = arith.constant 0 : index
    %c0_7 = arith.constant 0 : index
    %8 = vector.load %arg6[%c0_6, %c0_7] : memref<32x96xf32, #tpu.memory_space<vmem>>, vector<32x96xf32>
    tpu.vector_store %arg6[%c0_6, %c0_7], %7 {strides = array<i32>} : memref<32x96xf32, #tpu.memory_space<vmem>>, vector<32x96xf32>,
    %c0_i32_8 = arith.constant 0 : i32
    %9 = arith.cmpi eq, %arg2, %c0_i32_8 : i32
    %10 = arith.extui %9 : i1 to i32
    %c0_i32_9 = arith.constant 0 : i32
    %11 = arith.cmpi ne, %10, %c0_i32_9 : i32
    scf.if %11 {
      %c0_10 = arith.constant 0 : index
      %c0_11 = arith.constant 0 : index
      %12 = vector.load %arg6[%c0_10, %c0_11] : memref<32x96xf32, #tpu.memory_space<vmem>>, vector<32x96xf32>
      %c0_12 = arith.constant 0 : index
      %c0_13 = arith.constant 0 : index
      %13 = vector.load %arg5[%c0_12, %c0_13] : memref<32x96xf32, #tpu.memory_space<vmem>>, vector<32x96xf32>
      tpu.vector_store %arg5[%c0_12, %c0_13], %12 {strides = array<i32>} : memref<32x96xf32, #tpu.memory_space<vmem>>, vector<32x96xf32>,
    } else {
    }
    return
  }
  func.func @transform_0(%arg0: i32, %arg1: i32, %arg2: i32) -> (i32, i32) {
    %c0_i32 = arith.constant 0 : i32
    return %arg0, %arg2 : i32, i32
  }
  func.func @transform_1(%arg0: i32, %arg1: i32, %arg2: i32) -> (i32, i32) {
    %c0_i32 = arith.constant 0 : i32
    return %arg1, %arg2 : i32, i32
  }
  func.func @transform_2(%arg0: i32, %arg1: i32, %arg2: i32) -> (i32, i32) {
    %c0_i32 = arith.constant 0 : i32
    return %arg0, %arg1 : i32, i32
  }
}

module attributes {stable_mosaic.version = 11 : i64} {
  func.func @kernel(%arg0: i32, %arg1: memref<1x16x96xf32, #tpu.memory_space<vmem>>, %arg2: memref<1x16x32xf32, #tpu.memory_space<vmem>>) attributes {dimension_semantics = [#tpu.dimension_semantics<parallel>], iteration_bounds = array<i64: 2>, scalar_prefetch = 0 : i64, scratch_operands = 0 : i64, tpu.core_type = #tpu.core_type<tc>, window_params = [{transform_indices = @transform_0, window_bounds = array<i64: 1, 16, 96>}, {transform_indices = @transform_1, window_bounds = array<i64: 1, 16, 32>}]} {
    %c0 = arith.constant 0 : index
    %c0_0 = arith.constant 0 : index
    %c0_1 = arith.constant 0 : index
    %0 = vector.load %arg1[%c0, %c0_0, %c0_1] : memref<1x16x96xf32, #tpu.memory_space<vmem>>, vector<1x16x96xf32>
    %1 = vector.shape_cast %0 : vector<1x16x96xf32> to vector<16x96xf32>
    %2 = tpu.iota {dimensions = array<i32: 1>} : vector<4x16xi32>
    %3 = tpu.iota {dimensions = array<i32: 0>} : vector<4x16xi32>
    %c4_i32 = arith.constant 4 : i32
    %4 = vector.broadcast %c4_i32 : i32 to vector<4x16xi32>
    %5 = arith.muli %3, %4 : vector<4x16xi32>
    %6 = arith.cmpi sge, %2, %5 : vector<4x16xi32>
    %c4_i32_2 = arith.constant 4 : i32
    %7 = vector.broadcast %c4_i32_2 : i32 to vector<4x16xi32>
    %8 = arith.addi %5, %7 : vector<4x16xi32>
    %9 = arith.cmpi slt, %2, %8 : vector<4x16xi32>
    %10 = arith.andi %6, %9 : vector<4x16xi1>
    %11 = arith.extui %10 : vector<4x16xi1> to vector<4x16xi32>
    %12 = arith.sitofp %11 : vector<4x16xi32> to vector<4x16xf32>
    %cst = arith.constant 2.500000e-01 : f32
    %13 = vector.broadcast %cst : f32 to vector<4x16xf32>
    %14 = arith.mulf %12, %13 : vector<4x16xf32>
    %cst_3 = arith.constant dense<0.000000e+00> : vector<4x96xf32>
    %15 = tpu.matmul %14, %1, %cst_3 {dimension_numbers = #tpu.dot_dimension_numbers<[1], [0], [0], [1], [0, 0, 1, 1], [], []>} : vector<4x16xf32>, vector<16x96xf32>, vector<4x96xf32> -> vector<4x96xf32>
    %16 = vector.extract_strided_slice %15 {offsets = [0, 0], sizes = [4, 8], strides = [1, 1]} : vector<4x96xf32> to vector<4x8xf32>
    %17 = vector.extract_strided_slice %15 {offsets = [0, 32], sizes = [4, 8], strides = [1, 1]} : vector<4x96xf32> to vector<4x8xf32>
    %18 = vector.extract_strided_slice %15 {offsets = [0, 64], sizes = [4, 8], strides = [1, 1]} : vector<4x96xf32> to vector<4x8xf32>
    %cst_4 = arith.constant dense<0.000000e+00> : vector<4x4xf32>
    %19 = tpu.matmul %16, %17, %cst_4 {dimension_numbers = #tpu.dot_dimension_numbers<[1], [1], [0], [0], [0, 0, 1, 0], [], []>} : vector<4x8xf32>, vector<4x8xf32>, vector<4x4xf32> -> vector<4x4xf32>
    %cst_5 = arith.constant 0.353553385 : f32
    %20 = vector.broadcast %cst_5 : f32 to vector<4x4xf32>
    %21 = arith.mulf %19, %20 : vector<4x4xf32>
    %cst_6 = arith.constant dense<0xFF800000> : vector<4xf32>
    %22 = vector.multi_reduction <maximumf>, %21, %cst_6 [1] : vector<4x4xf32> to vector<4xf32>
    %23 = vector.shape_cast %22 : vector<4xf32> to vector<4x1xf32>
    %24 = vector.broadcast %23 : vector<4x1xf32> to vector<4x4xf32>
    %25 = arith.subf %21, %24 : vector<4x4xf32>
    %26 = math.exp %25 : vector<4x4xf32>
    %cst_7 = arith.constant dense<0.000000e+00> : vector<4x8xf32>
    %27 = tpu.matmul %26, %18, %cst_7 {dimension_numbers = #tpu.dot_dimension_numbers<[1], [0], [0], [1], [0, 0, 1, 1], [], []>} : vector<4x4xf32>, vector<4x8xf32>, vector<4x8xf32> -> vector<4x8xf32>
    %cst_8 = arith.constant dense<0.000000e+00> : vector<4xf32>
    %28 = vector.multi_reduction <add>, %26, %cst_8 [1] : vector<4x4xf32> to vector<4xf32>
    %29 = vector.shape_cast %28 : vector<4xf32> to vector<4x1xf32>
    %30 = tpu.reciprocal %29 {approx = true} : vector<4x1xf32> -> vector<4x1xf32>
    %31 = vector.broadcast %30 : vector<4x1xf32> to vector<4x8xf32>
    %32 = arith.mulf %27, %31 : vector<4x8xf32>
    %33 = vector.extract_strided_slice %15 {offsets = [0, 8], sizes = [4, 8], strides = [1, 1]} : vector<4x96xf32> to vector<4x8xf32>
    %34 = vector.extract_strided_slice %15 {offsets = [0, 40], sizes = [4, 8], strides = [1, 1]} : vector<4x96xf32> to vector<4x8xf32>
    %35 = vector.extract_strided_slice %15 {offsets = [0, 72], sizes = [4, 8], strides = [1, 1]} : vector<4x96xf32> to vector<4x8xf32>
    %cst_9 = arith.constant dense<0.000000e+00> : vector<4x4xf32>
    %36 = tpu.matmul %33, %34, %cst_9 {dimension_numbers = #tpu.dot_dimension_numbers<[1], [1], [0], [0], [0, 0, 1, 0], [], []>} : vector<4x8xf32>, vector<4x8xf32>, vector<4x4xf32> -> vector<4x4xf32>
    %cst_10 = arith.constant 0.353553385 : f32
    %37 = vector.broadcast %cst_10 : f32 to vector<4x4xf32>
    %38 = arith.mulf %36, %37 : vector<4x4xf32>
    %cst_11 = arith.constant dense<0xFF800000> : vector<4xf32>
    %39 = vector.multi_reduction <maximumf>, %38, %cst_11 [1] : vector<4x4xf32> to vector<4xf32>
    %40 = vector.shape_cast %39 : vector<4xf32> to vector<4x1xf32>
    %41 = vector.broadcast %40 : vector<4x1xf32> to vector<4x4xf32>
    %42 = arith.subf %38, %41 : vector<4x4xf32>
    %43 = math.exp %42 : vector<4x4xf32>
    %cst_12 = arith.constant dense<0.000000e+00> : vector<4x8xf32>
    %44 = tpu.matmul %43, %35, %cst_12 {dimension_numbers = #tpu.dot_dimension_numbers<[1], [0], [0], [1], [0, 0, 1, 1], [], []>} : vector<4x4xf32>, vector<4x8xf32>, vector<4x8xf32> -> vector<4x8xf32>
    %cst_13 = arith.constant dense<0.000000e+00> : vector<4xf32>
    %45 = vector.multi_reduction <add>, %43, %cst_13 [1] : vector<4x4xf32> to vector<4xf32>
    %46 = vector.shape_cast %45 : vector<4xf32> to vector<4x1xf32>
    %47 = tpu.reciprocal %46 {approx = true} : vector<4x1xf32> -> vector<4x1xf32>
    %48 = vector.broadcast %47 : vector<4x1xf32> to vector<4x8xf32>
    %49 = arith.mulf %44, %48 : vector<4x8xf32>
    %50 = vector.extract_strided_slice %15 {offsets = [0, 16], sizes = [4, 8], strides = [1, 1]} : vector<4x96xf32> to vector<4x8xf32>
    %51 = vector.extract_strided_slice %15 {offsets = [0, 48], sizes = [4, 8], strides = [1, 1]} : vector<4x96xf32> to vector<4x8xf32>
    %52 = vector.extract_strided_slice %15 {offsets = [0, 80], sizes = [4, 8], strides = [1, 1]} : vector<4x96xf32> to vector<4x8xf32>
    %cst_14 = arith.constant dense<0.000000e+00> : vector<4x4xf32>
    %53 = tpu.matmul %50, %51, %cst_14 {dimension_numbers = #tpu.dot_dimension_numbers<[1], [1], [0], [0], [0, 0, 1, 0], [], []>} : vector<4x8xf32>, vector<4x8xf32>, vector<4x4xf32> -> vector<4x4xf32>
    %cst_15 = arith.constant 0.353553385 : f32
    %54 = vector.broadcast %cst_15 : f32 to vector<4x4xf32>
    %55 = arith.mulf %53, %54 : vector<4x4xf32>
    %cst_16 = arith.constant dense<0xFF800000> : vector<4xf32>
    %56 = vector.multi_reduction <maximumf>, %55, %cst_16 [1] : vector<4x4xf32> to vector<4xf32>
    %57 = vector.shape_cast %56 : vector<4xf32> to vector<4x1xf32>
    %58 = vector.broadcast %57 : vector<4x1xf32> to vector<4x4xf32>
    %59 = arith.subf %55, %58 : vector<4x4xf32>
    %60 = math.exp %59 : vector<4x4xf32>
    %cst_17 = arith.constant dense<0.000000e+00> : vector<4x8xf32>
    %61 = tpu.matmul %60, %52, %cst_17 {dimension_numbers = #tpu.dot_dimension_numbers<[1], [0], [0], [1], [0, 0, 1, 1], [], []>} : vector<4x4xf32>, vector<4x8xf32>, vector<4x8xf32> -> vector<4x8xf32>
    %cst_18 = arith.constant dense<0.000000e+00> : vector<4xf32>
    %62 = vector.multi_reduction <add>, %60, %cst_18 [1] : vector<4x4xf32> to vector<4xf32>
    %63 = vector.shape_cast %62 : vector<4xf32> to vector<4x1xf32>
    %64 = tpu.reciprocal %63 {approx = true} : vector<4x1xf32> -> vector<4x1xf32>
    %65 = vector.broadcast %64 : vector<4x1xf32> to vector<4x8xf32>
    %66 = arith.mulf %61, %65 : vector<4x8xf32>
    %67 = vector.extract_strided_slice %15 {offsets = [0, 24], sizes = [4, 8], strides = [1, 1]} : vector<4x96xf32> to vector<4x8xf32>
    %68 = vector.extract_strided_slice %15 {offsets = [0, 56], sizes = [4, 8], strides = [1, 1]} : vector<4x96xf32> to vector<4x8xf32>
    %69 = vector.extract_strided_slice %15 {offsets = [0, 88], sizes = [4, 8], strides = [1, 1]} : vector<4x96xf32> to vector<4x8xf32>
    %cst_19 = arith.constant dense<0.000000e+00> : vector<4x4xf32>
    %70 = tpu.matmul %67, %68, %cst_19 {dimension_numbers = #tpu.dot_dimension_numbers<[1], [1], [0], [0], [0, 0, 1, 0], [], []>} : vector<4x8xf32>, vector<4x8xf32>, vector<4x4xf32> -> vector<4x4xf32>
    %cst_20 = arith.constant 0.353553385 : f32
    %71 = vector.broadcast %cst_20 : f32 to vector<4x4xf32>
    %72 = arith.mulf %70, %71 : vector<4x4xf32>
    %cst_21 = arith.constant dense<0xFF800000> : vector<4xf32>
    %73 = vector.multi_reduction <maximumf>, %72, %cst_21 [1] : vector<4x4xf32> to vector<4xf32>
    %74 = vector.shape_cast %73 : vector<4xf32> to vector<4x1xf32>
    %75 = vector.broadcast %74 : vector<4x1xf32> to vector<4x4xf32>
    %76 = arith.subf %72, %75 : vector<4x4xf32>
    %77 = math.exp %76 : vector<4x4xf32>
    %cst_22 = arith.constant dense<0.000000e+00> : vector<4x8xf32>
    %78 = tpu.matmul %77, %69, %cst_22 {dimension_numbers = #tpu.dot_dimension_numbers<[1], [0], [0], [1], [0, 0, 1, 1], [], []>} : vector<4x4xf32>, vector<4x8xf32>, vector<4x8xf32> -> vector<4x8xf32>
    %cst_23 = arith.constant dense<0.000000e+00> : vector<4xf32>
    %79 = vector.multi_reduction <add>, %77, %cst_23 [1] : vector<4x4xf32> to vector<4xf32>
    %80 = vector.shape_cast %79 : vector<4xf32> to vector<4x1xf32>
    %81 = tpu.reciprocal %80 {approx = true} : vector<4x1xf32> -> vector<4x1xf32>
    %82 = vector.broadcast %81 : vector<4x1xf32> to vector<4x8xf32>
    %83 = arith.mulf %78, %82 : vector<4x8xf32>
    %84 = tpu.concatenate %32, %49, %66, %83 in 1 : vector<4x8xf32>, vector<4x8xf32>, vector<4x8xf32>, vector<4x8xf32> -> vector<4x32xf32>
    %85 = tpu.iota {dimensions = array<i32: 0>} : vector<16x4xi32>
    %86 = tpu.iota {dimensions = array<i32: 1>} : vector<16x4xi32>
    %c4_i32_24 = arith.constant 4 : i32
    %87 = vector.broadcast %c4_i32_24 : i32 to vector<16x4xi32>
    %88 = arith.muli %86, %87 : vector<16x4xi32>
    %89 = arith.cmpi sge, %85, %88 : vector<16x4xi32>
    %c4_i32_25 = arith.constant 4 : i32
    %90 = vector.broadcast %c4_i32_25 : i32 to vector<16x4xi32>
    %91 = arith.addi %88, %90 : vector<16x4xi32>
    %92 = arith.cmpi slt, %85, %91 : vector<16x4xi32>
    %93 = arith.andi %89, %92 : vector<16x4xi1>
    %94 = arith.extui %93 : vector<16x4xi1> to vector<16x4xi32>
    %95 = arith.sitofp %94 : vector<16x4xi32> to vector<16x4xf32>
    %cst_26 = arith.constant dense<0.000000e+00> : vector<16x32xf32>
    %96 = tpu.matmul %95, %84, %cst_26 {dimension_numbers = #tpu.dot_dimension_numbers<[1], [0], [0], [1], [0, 0, 1, 1], [], []>} : vector<16x4xf32>, vector<4x32xf32>, vector<16x32xf32> -> vector<16x32xf32>
    %c0_27 = arith.constant 0 : index
    %c0_28 = arith.constant 0 : index
    %c0_29 = arith.constant 0 : index
    %97 = vector.load %arg2[%c0_27, %c0_28, %c0_29] : memref<1x16x32xf32, #tpu.memory_space<vmem>>, vector<1x16x32xf32>
    %98 = vector.shape_cast %97 : vector<1x16x32xf32> to vector<16x32xf32>
    %99 = vector.shape_cast %96 : vector<16x32xf32> to vector<1x16x32xf32>
    tpu.vector_store %arg2[%c0_27, %c0_28, %c0_29], %99 {strides = array<i32>} : memref<1x16x32xf32, #tpu.memory_space<vmem>>, vector<1x16x32xf32>,
    return
  }
  func.func @transform_0(%arg0: i32) -> (i32, i32, i32) {
    %c0_i32 = arith.constant 0 : i32
    %c0_i32_0 = arith.constant 0 : i32
    %c0_i32_1 = arith.constant 0 : i32
    return %arg0, %c0_i32, %c0_i32_0 : i32, i32, i32
  }
  func.func @transform_1(%arg0: i32) -> (i32, i32, i32) {
    %c0_i32 = arith.constant 0 : i32
    %c0_i32_0 = arith.constant 0 : i32
    %c0_i32_1 = arith.constant 0 : i32
    return %arg0, %c0_i32, %c0_i32_0 : i32, i32, i32
  }
}

module attributes {stable_mosaic.version = 11 : i64} {
  func.func @_linear_bias_kernel(%arg0: i32, %arg1: i32, %arg2: i32, %arg3: memref<32x32xf32, #tpu.memory_space<vmem>>, %arg4: memref<32x32xf32, #tpu.memory_space<vmem>>, %arg5: memref<1x32xf32, #tpu.memory_space<vmem>>, %arg6: memref<32x32xf32, #tpu.memory_space<vmem>>, %arg7: memref<32x32xf32, #tpu.memory_space<vmem>>) attributes {dimension_semantics = [#tpu.dimension_semantics<parallel>, #tpu.dimension_semantics<parallel>, #tpu.dimension_semantics<arbitrary>], iteration_bounds = array<i64: 1, 1, 1>, scalar_prefetch = 0 : i64, scratch_operands = 1 : i64, tpu.core_type = #tpu.core_type<tc>, window_params = [{transform_indices = @transform_0, window_bounds = array<i64: 32, 32>}, {transform_indices = @transform_1, window_bounds = array<i64: 32, 32>}, {transform_indices = @transform_2, window_bounds = array<i64: 1, 32>}, {transform_indices = @transform_3, window_bounds = array<i64: 32, 32>}]} {
    %c0_i32 = arith.constant 0 : i32
    %0 = arith.cmpi eq, %arg2, %c0_i32 : i32
    %1 = arith.extui %0 : i1 to i32
    %c0_i32_0 = arith.constant 0 : i32
    %2 = arith.cmpi ne, %1, %c0_i32_0 : i32
    scf.if %2 {
      %cst_10 = arith.constant 0.000000e+00 : f32
      %12 = vector.broadcast %cst_10 : f32 to vector<32x32xf32>
      %c0_11 = arith.constant 0 : index
      %c0_12 = arith.constant 0 : index
      %13 = vector.load %arg7[%c0_11, %c0_12] : memref<32x32xf32, #tpu.memory_space<vmem>>, vector<32x32xf32>
      tpu.vector_store %arg7[%c0_11, %c0_12], %12 {strides = array<i32>} : memref<32x32xf32, #tpu.memory_space<vmem>>, vector<32x32xf32>,
    } else {
    }
    %c0 = arith.constant 0 : index
    %c0_1 = arith.constant 0 : index
    %3 = vector.load %arg7[%c0, %c0_1] : memref<32x32xf32, #tpu.memory_space<vmem>>, vector<32x32xf32>
    %c0_2 = arith.constant 0 : index
    %c0_3 = arith.constant 0 : index
    %4 = vector.load %arg3[%c0_2, %c0_3] : memref<32x32xf32, #tpu.memory_space<vmem>>, vector<32x32xf32>
    %c0_4 = arith.constant 0 : index
    %c0_5 = arith.constant 0 : index
    %5 = vector.load %arg4[%c0_4, %c0_5] : memref<32x32xf32, #tpu.memory_space<vmem>>, vector<32x32xf32>
    %cst = arith.constant dense<0.000000e+00> : vector<32x32xf32>
    %6 = tpu.matmul %4, %5, %cst {dimension_numbers = #tpu.dot_dimension_numbers<[1], [1], [0], [0], [0, 0, 1, 0], [], []>} : vector<32x32xf32>, vector<32x32xf32>, vector<32x32xf32> -> vector<32x32xf32>
    %7 = arith.addf %3, %6 : vector<32x32xf32>
    %c0_6 = arith.constant 0 : index
    %c0_7 = arith.constant 0 : index
    %8 = vector.load %arg7[%c0_6, %c0_7] : memref<32x32xf32, #tpu.memory_space<vmem>>, vector<32x32xf32>
    tpu.vector_store %arg7[%c0_6, %c0_7], %7 {strides = array<i32>} : memref<32x32xf32, #tpu.memory_space<vmem>>, vector<32x32xf32>,
    %c0_i32_8 = arith.constant 0 : i32
    %9 = arith.cmpi eq, %arg2, %c0_i32_8 : i32
    %10 = arith.extui %9 : i1 to i32
    %c0_i32_9 = arith.constant 0 : i32
    %11 = arith.cmpi ne, %10, %c0_i32_9 : i32
    scf.if %11 {
      %c0_10 = arith.constant 0 : index
      %c0_11 = arith.constant 0 : index
      %12 = vector.load %arg7[%c0_10, %c0_11] : memref<32x32xf32, #tpu.memory_space<vmem>>, vector<32x32xf32>
      %c0_12 = arith.constant 0 : index
      %c0_13 = arith.constant 0 : index
      %13 = vector.load %arg5[%c0_12, %c0_13] : memref<1x32xf32, #tpu.memory_space<vmem>>, vector<1x32xf32>
      %14 = vector.broadcast %13 : vector<1x32xf32> to vector<32x32xf32>
      %15 = arith.addf %12, %14 : vector<32x32xf32>
      %c0_14 = arith.constant 0 : index
      %c0_15 = arith.constant 0 : index
      %16 = vector.load %arg6[%c0_14, %c0_15] : memref<32x32xf32, #tpu.memory_space<vmem>>, vector<32x32xf32>
      tpu.vector_store %arg6[%c0_14, %c0_15], %15 {strides = array<i32>} : memref<32x32xf32, #tpu.memory_space<vmem>>, vector<32x32xf32>,
    } else {
    }
    return
  }
  func.func @transform_0(%arg0: i32, %arg1: i32, %arg2: i32) -> (i32, i32) {
    %c0_i32 = arith.constant 0 : i32
    return %arg0, %arg2 : i32, i32
  }
  func.func @transform_1(%arg0: i32, %arg1: i32, %arg2: i32) -> (i32, i32) {
    %c0_i32 = arith.constant 0 : i32
    return %arg1, %arg2 : i32, i32
  }
  func.func @transform_2(%arg0: i32, %arg1: i32, %arg2: i32) -> (i32, i32) {
    %c0_i32 = arith.constant 0 : i32
    %c0_i32_0 = arith.constant 0 : i32
    return %c0_i32, %arg1 : i32, i32
  }
  func.func @transform_3(%arg0: i32, %arg1: i32, %arg2: i32) -> (i32, i32) {
    %c0_i32 = arith.constant 0 : i32
    return %arg0, %arg1 : i32, i32
  }
}

</mosaic_0001>

<bundles_post_ra>
// kernel: _lambda_.5
= control target key start
LH: loop header
LB: loop body
LE: loop exit
PB: predicated region body
PF: predicated region fallthrough
CT: control target
= control target key end

     0   :  { %vm19_vm0 = vcmask 261120   ;;  %v267_v7 = vmov 0.0   ;;  %s368_s0 = inlined_call_operand.vmem [shape: f32[32,32], index: 0, kind: input, shape index: {}]   ;;  %s369_s1 = inlined_call_operand.vmem [shape: f32[32,32], index: 1, kind: input, shape index: {}]   ;;  %s370_s2 = inlined_call_operand.vmem [shape: f32[1,32], index: 2, kind: input, shape index: {}]   ;;  %s371_s3 = inlined_call_operand.hbm [shape: f32[32,32], index: 3, kind: output, shape index: {}]  }
   0x1   :  { %v32_v0 = vld [vmem:[%s369_s1] sm:$0xff]  ;;  %v33_v1 = vld [vmem:[%s369_s1 + $0x8] sm:$0xff]  ;;  %v34_v2 = vld [vmem:[%s369_s1 + $0x10] sm:$0xff]  ;;  %21 = vst.msk [vmem:[#allocation2 + $0x8] sm:$0xff] %vm19_vm0, %v267_v7 }
   0x2   :  { %v223_v3 = vpack.c.bf16 %v33_v1, %v32_v0  ;;  %vm302_vm1 = vmpackc.low %vm19_vm0, %vm19_vm0  ;;  %v35_v5 = vld [vmem:[%s369_s1 + $0x18] sm:$0xff]  ;;  %v28_v6 = vld [vmem:[%s368_s0] sm:$0xff]  ;;  %20 = vst.msk [vmem:[#allocation2] sm:$0xff] %vm19_vm0, %v267_v7 }
   0x3   :  { %22 = vst.msk [vmem:[#allocation2 + $0x10] sm:$0xff] %vm19_vm0, %v267_v7  ;;  %23 = vst.msk [vmem:[#allocation2 + $0x18] sm:$0xff] %vm19_vm0, %v267_v7  ;;  %v229_v8 = vpack.c.bf16 %v35_v5, %v34_v2  ;;  %217 = vmatprep.mubr.msk.f32.mxu0 %vm19_vm0, %v28_v6  ;;  %v30_v9 = vld [vmem:[%s368_s0 + $0x10] sm:$0xff] }
   0x4   :  { %225 = vmatprep.subr.msk.bf16.mxu0 %vm302_vm1, %v223_v3  ;;  %235 = vmatprep.subr.msk.bf16.mxu1 %vm302_vm1, %v223_v3 }
   0x5   :  { %8 = vsyncpa [#allocation4], 0  ;;  %228 = vmatpush3.bf16.xpose.msk.msra.mxu0 %vm302_vm1, %v223_v3  ;;  %237 = vmatpush3.bf16.xpose.msk.msra.mxu1 %vm302_vm1, %v223_v3  ;;  %v29_v10 = vld [vmem:[%s368_s0 + $0x8] sm:$0xff]  ;;  %v31_v11 = vld [vmem:[%s368_s0 + $0x18] sm:$0xff]  ;;  %s268_s28 = smov [#allocation3]  }
   0x6   :  { %231 = vmatprep.subr.msk.bf16.mxu0 %vm302_vm1, %v229_v8  ;;  %236 = vmatprep.subr.msk.bf16.mxu1 %vm302_vm1, %v229_v8  ;;  %v200_v24 = vld [vmem:[%s370_s2] ss:$0 sm:$0xff]  ;;  %s181_s29 = sshll.u32 %s268_s28, 4  ;;  %s182_s29 = int_to_ptr.vmem [resolvable:$true] %s181_s29 }
   0x7   :  { %220 = vmatprep.mubr.msk.f32.mxu1 %vm19_vm0, %v30_v9  ;;  %s243_s2 = scalar_lea.vmem %s182_s29, 512  ;;  %p248_p1 = scmp.lt.s32.totalorder %s182_s29, %s182_s29 }
   0x8   :  { %v25_v12 = vld [vmem:[#allocation2 + $0x8] sm:$0xff]  ;;  %p244_p0 = scmp.ne.s32.totalorder %s182_s29, %s243_s2  ;;  %p249_p2 = scmp.lt.s32.totalorder %s243_s2, %s243_s2 }
   0x9   :  { %v24_v14 = vld [vmem:[#allocation2] sm:$0xff] }
   0xa   :  { %v27_v13 = vld [vmem:[#allocation2 + $0x18] sm:$0xff]  ;;  %v26_v15 = vld [vmem:[#allocation2 + $0x10] sm:$0xff]  ;;  %p250_p3 = por %p249_p2, %p248_p1 }
   0xc   :  { %p251_p4 = pnand %p250_p3, %p244_p0 }
   0xd   :  { %234 = vmatpush3.bf16.xpose.msk.msra.mxu0 %vm302_vm1, %v229_v8  ;;  %238 = vmatpush3.bf16.xpose.msk.msra.mxu1 %vm302_vm1, %v229_v8 }
  0x14   :  { %218 = vmatmul.mubr.msk.f32.vlgmr.msra.gmra.mrb[0].mxu0 %vm19_vm0, %v29_v10  ;;  %221 = vmatmul.mubr.msk.f32.vlgmr.msra.gmra.mrb[0].mxu1 %vm19_vm0, %v31_v11 }
  0xe7   :  { %v219_v16 = vpop.f32.mrb[0].mxu0  ;;  %v222_v17 = vpop.f32.mrb[0].mxu1 }
  0xe8   :  { %v147_v18 = vadd.f32 %v219_v16, %v25_v12  ;;  %v149_v19 = vadd.f32 %v222_v17, %v27_v13  ;;  %v127_v20 = vpop.f32.mrb[1].mxu0  ;;  %v137_v21 = vpop.f32.mrb[1].mxu1 }
  0xe9   :  { %v146_v22 = vadd.f32 %v127_v20, %v24_v14  ;;  %v148_v23 = vadd.f32 %v137_v21, %v26_v15 }
  0xea   :  { %151 = vst.msk [vmem:[#allocation2 + $0x8] sm:$0xff] %vm19_vm0, %v147_v18  ;;  %153 = vst.msk [vmem:[#allocation2 + $0x18] sm:$0xff] %vm19_vm0, %v149_v19 }
  0xeb   :  { %150 = vst.msk [vmem:[#allocation2] sm:$0xff] %vm19_vm0, %v146_v22  ;;  %152 = vst.msk [vmem:[#allocation2 + $0x10] sm:$0xff] %vm19_vm0, %v148_v23 }
  0xf1   :  { %v158_v25 = vld [vmem:[#allocation2 + $0x8] sm:$0xff]  ;;  %v160_v26 = vld [vmem:[#allocation2 + $0x18] sm:$0xff] }
  0xf2   :  { %v157_v27 = vld [vmem:[#allocation2] sm:$0xff]  ;;  %v159_v28 = vld [vmem:[#allocation2 + $0x10] sm:$0xff]  ;;  %v169_v29 = vadd.f32 %v200_v24, %v158_v25  ;;  %v171_v30 = vadd.f32 %v200_v24, %v160_v26 }
  0xf3   :  { %v168_v31 = vadd.f32 %v200_v24, %v157_v27  ;;  %v170_v32 = vadd.f32 %v200_v24, %v159_v28 }
  0xf4   :  { %173 = vst.msk [vmem:[#allocation3 + $0x8] sm:$0xff] %vm19_vm0, %v169_v29  ;;  %175 = vst.msk [vmem:[#allocation3 + $0x18] sm:$0xff] %vm19_vm0, %v171_v30 }
  0xf5   :  { %172 = vst.msk [vmem:[#allocation3] sm:$0xff] %vm19_vm0, %v168_v31  ;;  %174 = vst.msk [vmem:[#allocation3 + $0x10] sm:$0xff] %vm19_vm0, %v170_v32 }
  0xf6   :  { %254 = shalt.err (!%p251_p4)
}
  0xf7   :  { %s255_s5 = scalar_lea.hbm %s371_s3, 512 }
  0xf8   :  { %p256_p5 = scmp.ne.s32.totalorder %s371_s3, %s255_s5  ;;  %p259_p6 = scmp.lt.u32.totalorder %s255_s5, %s371_s3 }
  0xfa   :  { %p261_p7 = pnand %p259_p6, %p256_p5 }
  0xfc   :  { %264 = shalt.err (!%p261_p7)
}
  0xfd   :  { %s269_s10 = smov 128   ;;  %s270_s11 = smov 8  }
  0xfe   :  { %187 = dma.vmem_to_hbm [thread:$0]  %s182_s29, 512, %s371_s3, [#allocation4], %s269_s10, %s269_s10, %s270_s11  }
  0xff   :  { %265 = dma.done.wait [#allocation4], 512  }
 0x100   :  { %266 = vsyncadd [#allocation4], 4294966784 }
 0x101   :  { %191 = vsyncpa [#allocation4], 1 }

// kernel: _lambda_.3
= control target key start
LH: loop header
LB: loop body
LE: loop exit
PB: predicated region body
PF: predicated region fallthrough
CT: control target
= control target key end

     0   :  { %vm40_vm0 = vcmask 261120   ;;  %vm15_vm1 = vcmask 785408   ;;  %v309_v3 = vmov 0.0   ;;  %s455_s1 = inlined_call_operand.vmem [shape: f32[96,32], index: 1, kind: input, shape index: {}]   ;;  %s456_s0 = inlined_call_operand.vmem [shape: f32[32,32], index: 0, kind: input, shape index: {}]   ;;  %s457_s2 = inlined_call_operand.vmem [shape: f32[32,96], index: 2, kind: output, shape index: {}]  }
   0x1   :  { %v28_v0 = vld [vmem:[%s455_s1] sm:$0xff]  ;;  %v29_v1 = vld [vmem:[%s455_s1 + $0x8] sm:$0xff]  ;;  %vm333_vm2 = vmpackc.low %vm40_vm0, %vm40_vm0  ;;  %17 = vst.msk [vmem:[#allocation2 + $0x8] sm:$0xff] %vm15_vm1, %v309_v3 }
   0x2   :  { %16 = vst.msk [vmem:[#allocation2] sm:$0xff] %vm15_vm1, %v309_v3  ;;  %18 = vst.msk [vmem:[#allocation2 + $0x10] sm:$0xff] %vm15_vm1, %v309_v3  ;;  %v260_v4 = vpack.c.bf16 %v29_v1, %v28_v0  ;;  %v30_v5 = vld [vmem:[%s455_s1 + $0x10] sm:$0xff]  ;;  %v31_v6 = vld [vmem:[%s455_s1 + $0x18] sm:$0xff] }
   0x3   :  { %19 = vst.msk [vmem:[#allocation2 + $0x18] sm:$0xff] %vm15_vm1, %v309_v3  ;;  %v266_v7 = vpack.c.bf16 %v31_v6, %v30_v5  ;;  %v24_v8 = vld [vmem:[%s456_s0] sm:$0xff]  ;;  %v26_v9 = vld [vmem:[%s456_s0 + $0x10] sm:$0xff]  ;;  %v33_v11 = vld [vmem:[%s455_s1 + $0x28] sm:$0xff] }
   0x4   :  { %262 = vmatprep.subr.msk.bf16.mxu0 %vm333_vm2, %v260_v4  ;;  %296 = vmatprep.subr.msk.bf16.mxu1 %vm333_vm2, %v260_v4  ;;  %v32_v10 = vld [vmem:[%s455_s1 + $0x20] sm:$0xff]  ;;  %v34_v13 = vld [vmem:[%s455_s1 + $0x30] sm:$0xff]  ;;  %v35_v14 = vld [vmem:[%s455_s1 + $0x38] sm:$0xff] }
   0x5   :  { %265 = vmatpush3.bf16.xpose.msk.msra.mxu0 %vm333_vm2, %v260_v4  ;;  %302 = vmatpush3.bf16.xpose.msk.msra.mxu1 %vm333_vm2, %v260_v4  ;;  %v272_v12 = vpack.c.bf16 %v33_v11, %v32_v10  ;;  %v278_v15 = vpack.c.bf16 %v35_v14, %v34_v13  ;;  %v36_v16 = vld [vmem:[%s455_s1 + $0x40] sm:$0xff]  ;;  %v37_v17 = vld [vmem:[%s455_s1 + $0x48] sm:$0xff]  ;;  %v38_v19 = vld [vmem:[%s455_s1 + $0x50] sm:$0xff] }
   0x6   :  { %268 = vmatprep.subr.msk.bf16.mxu0 %vm333_vm2, %v266_v7  ;;  %297 = vmatprep.subr.msk.bf16.mxu1 %vm333_vm2, %v266_v7  ;;  %v284_v18 = vpack.c.bf16 %v37_v17, %v36_v16  ;;  %v39_v20 = vld [vmem:[%s455_s1 + $0x58] sm:$0xff]  ;;  %v25_v22 = vld [vmem:[%s456_s0 + $0x8] sm:$0xff] }
   0x7   :  { %254 = vmatprep.mubr.msk.f32.mxu0 %vm40_vm0, %v24_v8  ;;  %257 = vmatprep.mubr.msk.f32.mxu1 %vm40_vm0, %v26_v9  ;;  %v290_v21 = vpack.c.bf16 %v39_v20, %v38_v19  ;;  %v27_v23 = vld [vmem:[%s456_s0 + $0x18] sm:$0xff] }
   0x8   :  { %v21_v24 = vld [vmem:[#allocation2 + $0x8] sm:$0xff] }
   0x9   :  { %v20_v26 = vld [vmem:[#allocation2] sm:$0xff]  ;;  %v22_v27 = vld [vmem:[#allocation2 + $0x10] sm:$0xff] }
   0xa   :  { %v23_v25 = vld [vmem:[#allocation2 + $0x18] sm:$0xff] }
   0xd   :  { %271 = vmatpush3.bf16.xpose.msk.msra.mxu0 %vm333_vm2, %v266_v7  ;;  %303 = vmatpush3.bf16.xpose.msk.msra.mxu1 %vm333_vm2, %v266_v7 }
   0xe   :  { %274 = vmatprep.subr.msk.bf16.mxu0 %vm333_vm2, %v272_v12  ;;  %298 = vmatprep.subr.msk.bf16.mxu1 %vm333_vm2, %v272_v12 }
  0x15   :  { %277 = vmatpush3.bf16.xpose.msk.msra.mxu0 %vm333_vm2, %v272_v12  ;;  %304 = vmatpush3.bf16.xpose.msk.msra.mxu1 %vm333_vm2, %v272_v12 }
  0x16   :  { %280 = vmatprep.subr.msk.bf16.mxu0 %vm333_vm2, %v278_v15  ;;  %299 = vmatprep.subr.msk.bf16.mxu1 %vm333_vm2, %v278_v15 }
  0x1d   :  { %283 = vmatpush3.bf16.xpose.msk.msra.mxu0 %vm333_vm2, %v278_v15  ;;  %305 = vmatpush3.bf16.xpose.msk.msra.mxu1 %vm333_vm2, %v278_v15 }
  0x1e   :  { %286 = vmatprep.subr.msk.bf16.mxu0 %vm333_vm2, %v284_v18  ;;  %300 = vmatprep.subr.msk.bf16.mxu1 %vm333_vm2, %v284_v18 }
  0x25   :  { %289 = vmatpush3.bf16.xpose.msk.msra.mxu0 %vm333_vm2, %v284_v18  ;;  %306 = vmatpush3.bf16.xpose.msk.msra.mxu1 %vm333_vm2, %v284_v18 }
  0x26   :  { %292 = vmatprep.subr.msk.bf16.mxu0 %vm333_vm2, %v290_v21  ;;  %301 = vmatprep.subr.msk.bf16.mxu1 %vm333_vm2, %v290_v21 }
  0x2d   :  { %295 = vmatpush3.bf16.xpose.msk.msra.mxu0 %vm333_vm2, %v290_v21  ;;  %307 = vmatpush3.bf16.xpose.msk.msra.mxu1 %vm333_vm2, %v290_v21 }
  0x34   :  { %255 = vmatmul.mubr.msk.f32.vlgmr.msra.gmra.mrb[0].mxu0 %vm40_vm0, %v25_v22  ;;  %258 = vmatmul.mubr.msk.f32.vlgmr.msra.gmra.mrb[0].mxu1 %vm40_vm0, %v27_v23 }
 0x107   :  { %v256_v28 = vpop.f32.mrb[0].mxu0  ;;  %v259_v29 = vpop.f32.mrb[0].mxu1 }
 0x108   :  { %v175_v30 = vadd.f32 %v256_v28, %v21_v24  ;;  %v177_v31 = vadd.f32 %v259_v29, %v23_v25  ;;  %v155_v32 = vpop.f32.mrb[1].mxu0  ;;  %v165_v33 = vpop.f32.mrb[1].mxu1 }
 0x109   :  { %v174_v34 = vadd.f32 %v155_v32, %v20_v26  ;;  %v176_v35 = vadd.f32 %v165_v33, %v22_v27 }
 0x10a   :  { %180 = vst.msk [vmem:[#allocation2 + $0x8] sm:$0xff] %vm15_vm1, %v175_v30  ;;  %182 = vst.msk [vmem:[#allocation2 + $0x18] sm:$0xff] %vm15_vm1, %v177_v31 }
 0x10b   :  { %179 = vst.msk [vmem:[#allocation2] sm:$0xff] %vm15_vm1, %v174_v34  ;;  %181 = vst.msk [vmem:[#allocation2 + $0x10] sm:$0xff] %vm15_vm1, %v176_v35 }
 0x111   :  { %v187_v36 = vld [vmem:[#allocation2 + $0x8] sm:$0xff]  ;;  %v189_v37 = vld [vmem:[#allocation2 + $0x18] sm:$0xff] }
 0x112   :  { %191 = vst.msk [vmem:[%s457_s2 + $0x8] sm:$0xff] %vm15_vm1, %v187_v36  ;;  %193 = vst.msk [vmem:[%s457_s2 + $0x18] sm:$0xff] %vm15_vm1, %v189_v37  ;;  %v186_v38 = vld [vmem:[#allocation2] sm:$0xff]  ;;  %v188_v39 = vld [vmem:[#allocation2 + $0x10] sm:$0xff] }
 0x113   :  { %190 = vst.msk [vmem:[%s457_s2] sm:$0xff] %vm15_vm1, %v186_v38  ;;  %192 = vst.msk [vmem:[%s457_s2 + $0x10] sm:$0xff] %vm15_vm1, %v188_v39 }

// kernel: _lambda_.4
= control target key start
LH: loop header
LB: loop body
LE: loop exit
PB: predicated region body
PF: predicated region fallthrough
CT: control target
= control target key end

     0   :  { %s1236_s6 = smov 0   ;;  %s1351_s0 = inlined_call_operand.vmem [shape: f32[2,16,96], index: 0, kind: input, shape index: {}]   ;;  %s1352_s1 = inlined_call_operand.vmem [shape: f32[2,16,32], index: 1, kind: output, shape index: {}]  }
   0x1 LB: > { %s1047_s7 = sadd.s32 4294967295, %s1207_s6   ;;  %p1051_p0 = scmp.ge.s32.totalorder %s1207_s6, 1  ;;  %s1207_s6 = sphi %s1236_s6, %s11_s6  }
   0x2   : > { %p87_p1 = scmp.lt.s32.totalorder %s1207_s6, 3 }
   0x4   : > { %p88_p2 = pnand %p1051_p0, %p87_p1 }
   0x5   : > { %p107_p3 = scmp.lt.s32.totalorder (!%p88_p2), %s1047_s7, 1  ;;  %v119_v0 = vlaneseq (!%p88_p2)  ;;  %v1209_v1 = vmov (!%p88_p2), 0.0|0.0   ;;  %vm1210_vm0 = vmmov (!%p88_p2), 0   ;;  %v1211_v2 = vmov (!%p88_p2), 0.0   ;;  %s1212_s12 = smov (!%p88_p2), 120  }
   0x6   : > { %91 = sbr.rel (%p88_p2) target bundleno = 1323 (0x52b), region = 24  ;;  %1157 = vmatprep.subr.bf16.mxu0 (!%p88_p2), %v1209_v1  ;;  %1109 = vmatprep.mubr.msk.f32.mxu0 (!%p88_p2), %vm1210_vm0, %v1211_v2  ;;  %vm131_vm4 = vcmask (!%p88_p2), 130048   ;;  %s1213_s13 = smov (!%p88_p2), 96   ;;  %vm208_vm5 = vcmask (!%p88_p2), 64512   ;;  %vm284_vm6 = vcmask (!%p88_p2), 27648   ;;  %vm297_vm7 = vcmask (!%p88_p2), 1043456  }
   0x7   : > { %v1248_v3 = vand.u32 (!%p88_p2), 127, %v119_v0  ;;  %v1250_v4 = vshrl.u32 (!%p88_p2), %v119_v0, 7  ;;  %1112 = vmatprep.subr.mxu1 (!%p88_p2), %v1211_v2  ;;  %1114 = vmatprep.mubr.msk.f32.mxu1 (!%p88_p2), %vm1210_vm0, %v1211_v2  ;;  %s1214_s14 = smov (!%p88_p2), 80   ;;  %s1215_s15 = smov (!%p88_p2), 88   ;;  %vm293_vm8 = vcmask (!%p88_p2), 31744   ;;  %vm890_vm15 = vcmask (!%p88_p2), 195584  }
   0x8   : > { %s1216_s16 = smov (!%p88_p2), 72   ;;  %s1217_s17 = smov (!%p88_p2), 112  }
   0x9   : > { %v123_v5 = vmul.u32 (!%p88_p2), 4, %v1250_v4  ;;  %s1218_s18 = smov (!%p88_p2), 104   ;;  %s1219_s19 = smov (!%p88_p2), 56  }
   0xa   : > { %s1220_s20 = smov (!%p88_p2), 64   ;;  %s1221_s21 = smov (!%p88_p2), 40  }
   0xb   : > { %vm124_vm1 = vcmp.ge.s32.totalorder (!%p88_p2), %v1248_v3, %v123_v5  ;;  %v125_v8 = vadd.s32 (!%p88_p2), 4, %v123_v5  ;;  %s1222_s22 = smov (!%p88_p2), 48   ;;  %s1223_s23 = smov (!%p88_p2), 8  }
   0xc   : > { %s1224_s24 = smov (!%p88_p2), 16   ;;  %s1225_s25 = smov (!%p88_p2), 24  }
   0xd   : > { %s1356_s7 = smov (!%p107_p3, %s1047_s7), 1  ;;  %vm126_vm2 = vcmp.lt.s32.totalorder %v1248_v3, %v125_v8  ;;  %v893_v8 = vmul.u32 4, %v1248_v3 }
   0xe   : > { %s1081_s8 = sshll.u32 %s1356_s7, 4  ;;  %vm127_vm3 = vmand %vm124_vm1, %vm126_vm2 }
   0xf   : > { %s111_s11 = scalar_lea.vmem %s1351_s0, %s1081_s8  ;;  %v1056_v10 = vsel %vm127_vm3, 1.0, %v1211_v2  ;;  %vm894_vm9 = vcmp.ge.s32.totalorder %v1250_v4, %v893_v8  ;;  %s116_s28 = scalar_lea.vmem %s1352_s1, %s1081_s8 }
  0x10   : > { %v117_v6 = vld [vmem:[%s111_s11] sm:$0xff]  ;;  %v118_v7 = vld [vmem:[%s111_s11 + $0x8] sm:$0xff]  ;;  %v130_v11 = vmul.f32 0.25, %v1056_v10  ;;  %v896_v10 = vadd.s32 4, %v893_v8 }
  0x11   : > { %v1158_v9 = vpack.c.bf16 %v118_v7, %v117_v6 }
  0x12   : > { %vm897_vm10 = vcmp.lt.s32.totalorder %v1250_v4, %v896_v10 }
  0x13   : > { %1159 = vmatpush3.bf16.msra.mxu0 %v1158_v9  ;;  %vm899_vm11 = vmand %vm894_vm9, %vm897_vm10 }
  0x14   : > { %1117 = vmatprep.subr.mxu0 %v1211_v2 }
  0x16   : > { %1110 = vmatmul.mubr.msk.f32.vlgmr.msra.gmra.mrb[0].mxu0 %vm131_vm4, %v130_v11  ;;  %v892_v11 = vadd.s32 8, %v1250_v4 }
  0x17   : > { %1119 = vmatprep.mubr.msk.f32.mxu0 %vm1210_vm0, %v1211_v2 }
  0x18   : > { %vm895_vm12 = vcmp.ge.s32.totalorder %v892_v11, %v893_v8  ;;  %vm898_vm13 = vcmp.lt.s32.totalorder %v892_v11, %v896_v10 }
  0x19   : > { %vm1330_vm14 = vmand %vm895_vm12, %vm898_vm13 }
  0xe9   : > { %v1269_v12 = vpop.f32.mrb[0].mxu0 }
  0xea   : > { %375 = vrot.lane.b32.xlu1 %v1269_v12, %s1212_s12  ;;  %206 = vrot.lane.b32.xlu0 %v1269_v12, %s1213_s13  ;;  %v1111_v13 = vpop.f32.mrb[1].mxu0 }
  0xee   : > { %544 = vrot.lane.b32.xlu1 %v1269_v12, %s1214_s14  ;;  %377 = vrot.lane.b32.xlu0 %v1269_v12, %s1215_s15 }
  0xf2   : > { %711 = vrot.lane.b32.xlu1 %v1269_v12, %s1216_s16  ;;  %542 = vrot.lane.b32.xlu0 %v1269_v12, %s1217_s17 }
  0xf6   : > { %709 = vrot.lane.b32.xlu0 %v1269_v12, %s1218_s18 }
 0x15c   : > { %v376_v14 = vpop.permute.xlu1 %375  ;;  %v207_v15 = vpop.permute.xlu0 %206 }
 0x15d   : > { %1113 = vmatpush3.xpose.msk.msra.mxu1 %vm208_vm5, %v207_v15 }
 0x15e   : > { %1122 = vmatprep.subr.mxu1 %v1211_v2 }
 0x160   : > { %1115 = vmatmul.mubr.msk.f32.vlgmr.msra.gmra.mrb[0].mxu1 %vm208_vm5, %v1269_v12  ;;  %v378_v16 = vpop.permute.xlu0 %377  ;;  %v545_v17 = vpop.permute.xlu1 %544 }
 0x161   : > { %1123 = vmatpush3.xpose.msk.msra.mxu1 %vm208_vm5, %v378_v16  ;;  %1124 = vmatprep.mubr.msk.f32.mxu1 %vm1210_vm0, %v1211_v2  ;;  %v1074_v16 = vsel %vm899_vm11, 1.0, %v1211_v2 }
 0x162   : > { %1132 = vmatprep.subr.mxu1 %v1211_v2 }
 0x164   : > { %1125 = vmatmul.mubr.msk.f32.vlgmr.msra.gmra.mrb[2].mxu1 %vm208_vm5, %v376_v14  ;;  %v543_v18 = vpop.permute.xlu0 %542  ;;  %v712_v19 = vpop.permute.xlu1 %711 }
 0x165   : > { %1133 = vmatpush3.xpose.msk.msra.mxu1 %vm208_vm5, %v545_v17  ;;  %1134 = vmatprep.mubr.msk.f32.mxu1 %vm1210_vm0, %v1211_v2 }
 0x166   : > { %1142 = vmatprep.subr.mxu1 %v1211_v2 }
 0x168   : > { %1135 = vmatmul.mubr.msk.f32.vlgmr.msra.gmra.mrb[4].mxu1 %vm208_vm5, %v543_v18  ;;  %v710_v20 = vpop.permute.xlu0 %709 }
 0x169   : > { %1143 = vmatpush3.xpose.msk.msra.mxu1 %vm208_vm5, %v712_v19  ;;  %1144 = vmatprep.mubr.msk.f32.mxu1 %vm1210_vm0, %v1211_v2 }
 0x16c   : > { %1145 = vmatmul.mubr.msk.f32.vlgmr.msra.gmra.mrb[6].mxu1 %vm208_vm5, %v710_v20 }
 0x16d   : > { %1154 = vmatprep.mubr.msk.f32.mxu1 %vm293_vm8, %v1074_v16 }
 0x233   : > { %v279_v21 = vpop.f32.mrb[0].mxu1 }
 0x234   : > { %v283_v22 = vmul.f32 0.35355338, %v279_v21  ;;  %v1116_v23 = vpop.f32.mrb[1].mxu1 }
 0x236   : > { %v285_v24 = vsel %vm284_vm6, %v283_v22, -inf }
 0x237   : > { %286 = vmax.xlane.f32.xlu1 %v285_v24  ;;  %v449_v25 = vpop.f32.mrb[2].mxu1 }
 0x238   : > { %v453_v26 = vmul.f32 0.35355338, %v449_v25  ;;  %v1126_v27 = vpop.f32.mrb[3].mxu1 }
 0x23a   : > { %v454_v28 = vsel %vm284_vm6, %v453_v26, -inf }
 0x23b   : > { %455 = vmax.xlane.f32.xlu0 %v454_v28  ;;  %v616_v29 = vpop.f32.mrb[4].mxu1 }
 0x23c   : > { %v620_v30 = vmul.f32 0.35355338, %v616_v29  ;;  %v1136_v31 = vpop.f32.mrb[5].mxu1  ;;  %v1075_v29 = vsel %vm1330_vm14, 1.0, %v1211_v2 }
 0x23e   : > { %v621_v32 = vsel %vm284_vm6, %v620_v30, -inf }
 0x23f   : > { %622 = vmax.xlane.f32.xlu0 %v621_v32  ;;  %v783_v33 = vpop.f32.mrb[6].mxu1 }
 0x240   : > { %v1146_v34 = vpop.f32.mrb[7].mxu1  ;;  %v787_v35 = vmul.f32 0.35355338, %v783_v33 }
 0x242   : > { %v788_v36 = vsel %vm284_vm6, %v787_v35, -inf }
 0x248   : > { %460 = vrot.lane.b32.xlu1 %v1269_v12, %s1219_s19 }
 0x255   : > { %291 = vrot.lane.b32.xlu0 %v1269_v12, %s1220_s20 }
 0x259   : > { %794 = vrot.lane.b32.xlu0 %v1269_v12, %s1221_s21 }
 0x26c   : > { %789 = vmax.xlane.f32.xlu1 %v788_v36 }
 0x27d   : > { %627 = vrot.lane.b32.xlu1 %v1269_v12, %s1222_s22 }
 0x2c4   : > { %v287_v37 = vpop.xlane.xlu1 %286 }
 0x2c5   : > { %v288_v38 = vsub.f32 %v283_v22, %v287_v37 }
 0x2c7   : > { %v289_v39 = vmul.f32 1.442695, %v288_v38 }
 0x2c8   : > { %v456_v40 = vpop.xlane.xlu0 %455  ;;  %v461_v48 = vpop.permute.xlu1 %460 }
 0x2c9   : > { %1185 = vpow2.f32 %v289_v39  ;;  %v457_v41 = vsub.f32 %v453_v26, %v456_v40 }
 0x2cb   : > { %v458_v42 = vmul.f32 1.442695, %v457_v41 }
 0x2cc   : > { %v623_v43 = vpop.xlane.xlu0 %622 }
 0x2cd   : > { %1187 = vpow2.f32 %v458_v42  ;;  %v624_v44 = vsub.f32 %v620_v30, %v623_v43 }
 0x2cf   : > { %v625_v45 = vmul.f32 1.442695, %v624_v44 }
 0x2d0   : > { %v292_v46 = vpop.permute.xlu0 %291 }
 0x2d1   : > { %1189 = vpow2.f32 %v625_v45  ;;  %1118 = vmatpush3.msk.msra.mxu0 %vm297_vm7, %v292_v46 }
 0x2d2   : > { %1127 = vmatprep.subr.mxu0 %v1211_v2 }
 0x2d3   : > { %v1186_v47 = vpop.eup %1185 }
 0x2d4   : > { %1120 = vmatmul.mubr.msk.f32.vlgmr.msra.gmra.mrb[2].mxu0 %vm293_vm8, %v1186_v47  ;;  %v370_v52 = vsel %vm284_vm6, %v1186_v47, 0.0  ;;  %v795_v58 = vpop.permute.xlu0 %794 }
 0x2d5   : > { %1128 = vmatpush3.msk.msra.mxu0 %vm297_vm7, %v461_v48  ;;  %1129 = vmatprep.mubr.msk.f32.mxu0 %vm1210_vm0, %v1211_v2 }
 0x2d6   : > { %1137 = vmatprep.subr.mxu0 %v1211_v2 }
 0x2d7   : > { %v1188_v49 = vpop.eup %1187 }
 0x2d8   : > { %1130 = vmatmul.mubr.msk.f32.vlgmr.msra.gmra.mrb[4].mxu0 %vm293_vm8, %v1188_v49  ;;  %v537_v50 = vsel %vm284_vm6, %v1188_v49, 0.0 }
 0x2d9   : > { %538 = vadd.xlane.f32.xlu1 %v537_v50  ;;  %1139 = vmatprep.mubr.msk.f32.mxu0 %vm1210_vm0, %v1211_v2 }
 0x2db   : > { %v1190_v51 = vpop.eup %1189 }
 0x2dc   : > { %v704_v53 = vsel %vm284_vm6, %v1190_v51, 0.0 }
 0x2dd   : > { %371 = vadd.xlane.f32.xlu1 %v370_v52  ;;  %705 = vadd.xlane.f32.xlu0 %v704_v53 }
 0x2f9   : > { %v790_v54 = vpop.xlane.xlu1 %789 }
 0x2fa   : > { %v791_v55 = vsub.f32 %v787_v35, %v790_v54 }
 0x2fc   : > { %v792_v56 = vmul.f32 1.442695, %v791_v55 }
 0x2fd   : > { %v628_v57 = vpop.permute.xlu1 %627 }
 0x2fe   : > { %1191 = vpow2.f32 %v792_v56  ;;  %1138 = vmatpush3.msk.msra.mxu0 %vm297_vm7, %v628_v57 }
 0x2ff   : > { %1140 = vmatmul.mubr.msk.f32.vlgmr.msra.gmra.mrb[6].mxu0 %vm293_vm8, %v1190_v51  ;;  %1147 = vmatprep.subr.mxu0 %v1211_v2 }
 0x300   : > { %1148 = vmatpush3.msk.msra.mxu0 %vm297_vm7, %v795_v58  ;;  %1149 = vmatprep.mubr.msk.f32.mxu0 %vm1210_vm0, %v1211_v2  ;;  %vm989_vm0 = vcmask 261120  }
 0x308   : > { %v1192_v59 = vpop.eup %1191 }
 0x309   : > { %1150 = vmatmul.mubr.msk.f32.vlgmr.msra.gmra.mrb[8].mxu0 %vm293_vm8, %v1192_v59  ;;  %v871_v60 = vsel %vm284_vm6, %v1192_v59, 0.0 }
 0x30a   : > { %872 = vadd.xlane.f32.xlu0 %v871_v60 }
 0x366   : > { %v539_v61 = vpop.xlane.xlu1 %538 }
 0x367   : > { %1193 = vrcp.f32 %v539_v61 }
 0x36a   : > { %v706_v7 = vpop.xlane.xlu0 %705  ;;  %v372_v4 = vpop.xlane.xlu1 %371 }
 0x36b   : > { %1195 = vrcp.f32 %v706_v7 }
 0x371   : > { %v1194_v0 = vpop.eup %1193 }
 0x375   : > { %v1196_v12 = vpop.eup %1195 }
 0x397   : > { %v873_v9 = vpop.xlane.xlu0 %872 }
 0x398   : > { %1197 = vrcp.f32 %v873_v9 }
 0x399   : > { %1199 = vrcp.f32 %v372_v4 }
 0x3a2   : > { %v1198_v17 = vpop.eup %1197 }
 0x3a3   : > { %v1200_v21 = vpop.eup %1199 }
 0x3a7   : > { %v366_v62 = vpop.f32.mrb[2].mxu0 }
 0x3a8   : > { %v1121_v63 = vpop.f32.mrb[3].mxu0  ;;  %v374_v24 = vmul.f32 %v1200_v21, %v366_v62 }
 0x3ab   : > { %v533_v1 = vpop.f32.mrb[4].mxu0 }
 0x3ac   : > { %v541_v5 = vmul.f32 %v1194_v0, %v533_v1  ;;  %v1131_v6 = vpop.f32.mrb[5].mxu0 }
 0x3ae   : > { %877 = vrot.lane.b32.xlu0 %v541_v5, %s1223_s23 }
 0x3d2   : > { %v700_v13 = vpop.f32.mrb[6].mxu0 }
 0x3d3   : > { %v708_v14 = vmul.f32 %v1196_v12, %v700_v13  ;;  %v1141_v15 = vpop.f32.mrb[7].mxu0 }
 0x3d5   : > { %881 = vrot.lane.b32.xlu1 %v708_v14, %s1224_s24 }
 0x3dc   : > { %v867_v18 = vpop.f32.mrb[8].mxu0 }
 0x3dd   : > { %v875_v19 = vmul.f32 %v1198_v17, %v867_v18  ;;  %v1151_v20 = vpop.f32.mrb[9].mxu0 }
 0x3df   : > { %885 = vrot.lane.b32.xlu1 %v875_v19, %s1225_s25 }
 0x420   : > { %v878_v22 = vpop.permute.xlu0 %877 }
 0x421   : > { %v888_v25 = vsel %vm208_vm5, %v374_v24, %v878_v22 }
 0x447   : > { %v882_v23 = vpop.permute.xlu1 %881 }
 0x448   : > { %v889_v26 = vsel %vm131_vm4, %v888_v25, %v882_v23 }
 0x451   : > { %v886_v27 = vpop.permute.xlu1 %885 }
 0x452   : > { %v891_v28 = vsel %vm890_vm15, %v889_v26, %v886_v27 }
 0x453   : > { %1152 = vmatprep.subr.msk.mxu1 %vm297_vm7, %v891_v28 }
 0x454   : > { %1153 = vmatpush3.msk.msra.mxu1 %vm297_vm7, %v891_v28 }
 0x455   : > { %1155 = vmatmul.mubr.msk.f32.vlgmr.msra.gmra.mrb[8].mxu1 %vm293_vm8, %v1075_v29 }
 0x528   : > { %v1156_v30 = vpop.f32.mrb[8].mxu1 }
 0x529   : > { %991 = vst.msk [vmem:[%s116_s28 + $0x8] sm:$0xff] %vm989_vm0, %v1156_v30  ;;  %v980_v31 = vpop.f32.mrb[9].mxu1 }
 0x52a   : > { %990 = vst.msk [vmem:[%s116_s28] sm:$0xff] %vm989_vm0, %v980_v31 }
 0x52b PF: > { %s11_s6 = sadd.s32 1, %s1207_s6  }
 0x52c   : > { %p8_p4 = scmp.ge.s32.totalorder %s11_s6, 4  }
 0x52e   :  { %10 = sbr.rel (!%p8_p4) target bundleno = 1 (0x1), region = 54 }

</bundles_post_ra>
